<compile_context>
chip_gen: v7x
topology: tpu7x:2x2x1
jax: 0.10.0
libtpu: 0.0.40
codegen_flags: <defaults>
</compile_context>

<pallas_src>
import functools

import jax
import jax.numpy as jnp
from jax import lax
from jax.experimental import pallas as pl
from jax.experimental.pallas import tpu as pltpu

_LN_EPS = 1e-5


def _round_up(n, m):
    return ((n + m - 1) // m) * m


def _cdiv(a, b):
    return (a + b - 1) // b


def _ln_relu(h):
    """LayerNorm (elementwise_affine=False, biased variance, eps=1e-5) over the last dim,
    then ReLU. All math in f32 (h is an f32 MXU accumulator)."""
    inv_d = 1.0 / h.shape[-1]
    mean = jnp.sum(h, axis=-1, keepdims=True) * inv_d
    centered = h - mean
    var = jnp.sum(centered * centered, axis=-1, keepdims=True) * inv_d
    return jnp.maximum(centered * lax.rsqrt(var + _LN_EPS), 0.0)


def _decoder_kernel(x_ref, w0_ref, b0_ref, w1_ref, b1_ref, w2_ref, b2_ref, o_ref):
    mxu_dtype = w0_ref.dtype

    # initial_layer: Linear -> LayerNorm -> ReLU   (Dropout == identity in eval)
    h = jnp.dot(x_ref[...].astype(mxu_dtype), w0_ref[...],
                preferred_element_type=jnp.float32) + b0_ref[...]
    h = _ln_relu(h)

    # residual block (num_blocks=1): Linear -> LayerNorm -> ReLU
    # (the reference ResidualBlock never adds `identity` back, so no residual add)
    h = jnp.dot(h.astype(mxu_dtype), w1_ref[...],
                preferred_element_type=jnp.float32) + b1_ref[...]
    h = _ln_relu(h)

    # final_layer: Linear
    out = jnp.dot(h.astype(mxu_dtype), w2_ref[...],
                  preferred_element_type=jnp.float32) + b2_ref[...]
    o_ref[...] = out.astype(o_ref.dtype)


@functools.partial(jax.jit, static_argnames=("block_b", "vmem_limit_bytes"))
def custom_decoder_forward(x, w0, b0, w1, b1, w2, b2, *,
                           block_b=2048, vmem_limit_bytes=None):
    B, H = x.shape
    D = w0.shape[1]            # intermediate_dim
    out_dim = w2.shape[1]      # input_dim
    out_dtype = x.dtype

    # Batch tile: large default (sweep 1024-4096), f32 sublane aligned (8), clamped to B.
    align = 8
    B_al = _round_up(B, align)
    bb = min(_round_up(max(block_b, align), align), B_al)
    # v7x megacore: guarantee >=2 grid steps whenever the batch spans more than one minimal
    # sublane tile, so the "parallel" batch axis shards across both TensorCores.
    if B_al > align:
        bb = min(bb, _round_up(_cdiv(B_al, 2), align))
    grid = (_cdiv(B, bb),)     # ragged tail: OOB rows read garbage, OOB stores discarded

    # VMEM actually needed: double-buffered x/out tiles + one copy of the tiny weights,
    # with 2x + 2 MiB headroom, capped well below v7x's 64 MiB per-core VMEM.
    if vmem_limit_bytes is None:
        tile_bytes = 2 * bb * (H + out_dim) * x.dtype.itemsize
        w_bytes = ((w0.size + w1.size + w2.size) * w0.dtype.itemsize
                   + (b0.size + b1.size + b2.size) * 4)
        vmem_limit_bytes = min(32 * 1024 * 1024,
                               max(2 * (tile_bytes + w_bytes) + (2 << 20),
                                   4 * 1024 * 1024))

    flops = 2 * B * (H * D + D * D + D * out_dim)
    bytes_accessed = (B * (H + out_dim) * x.dtype.itemsize
                      + (w0.size + w1.size + w2.size) * w0.dtype.itemsize
                      + (b0.size + b1.size + b2.size) * 4)

    # Weights / biases are grid-invariant (constant index_map): the pipeline keeps them
    # resident in VMEM; only the x / out tiles stream per grid step.
    def w_spec(shape):
        return pl.BlockSpec(shape, lambda i: (0, 0))

    return pl.pallas_call(
        _decoder_kernel,
        out_shape=jax.ShapeDtypeStruct((B, out_dim), out_dtype),
        grid=grid,
        in_specs=[
            pl.BlockSpec((bb, H), lambda i: (i, 0)),   # x tile (streamed, true width)
            w_spec((H, D)),                            # W0
            w_spec((1, D)),                            # b0
            w_spec((D, D)),                            # W1
            w_spec((1, D)),                            # b1
            w_spec((D, out_dim)),                      # W2
            w_spec((1, out_dim)),                      # b2
        ],
        out_specs=pl.BlockSpec((bb, out_dim), lambda i: (i, 0)),  # true (narrow) last dim
        compiler_params=pltpu.CompilerParams(
            dimension_semantics=("parallel",),
            vmem_limit_bytes=vmem_limit_bytes,
        ),
        cost_estimate=pl.CostEstimate(flops=flops, transcendentals=2 * B,
                                      bytes_accessed=bytes_accessed),
    )(x, w0, b0, w1, b1, w2, b2)


def init_params(key, hidden_size, input_dim):
    """Deterministic PyTorch-style uniform init; weights stored as [in, out] (f32 masters)."""
    intermediate_dim = max(hidden_size, input_dim)

    def linear_init(k, fan_in, fan_out):
        kw, kb = jax.random.split(k)
        bound = 1.0 / (fan_in ** 0.5)
        w = jax.random.uniform(kw, (fan_in, fan_out), jnp.float32, -bound, bound)
        b = jax.random.uniform(kb, (1, fan_out), jnp.float32, -bound, bound)
        return w, b

    k0, k1, k2 = jax.random.split(key, 3)
    w0, b0 = linear_init(k0, hidden_size, intermediate_dim)
    w1, b1 = linear_init(k1, intermediate_dim, intermediate_dim)
    w2, b2 = linear_init(k2, intermediate_dim, input_dim)
    return (w0, b0, w1, b1, w2, b2)


def prepare_params(params, mxu_dtype=jnp.bfloat16):
    """One-time conversion to the kernel's device layout: bf16 weights, f32 (1,N) biases.
    Done outside the per-call jit path so the forward trace contains only the kernel."""
    w0, b0, w1, b1, w2, b2 = params
    return (w0.astype(mxu_dtype), b0.astype(jnp.float32),
            w1.astype(mxu_dtype), b1.astype(jnp.float32),
            w2.astype(mxu_dtype), b2.astype(jnp.float32))


def reference_forward(x, w0, b0, w1, b1, w2, b2, matmul_dtype=None):
    """Pure-JAX reference. matmul_dtype=bf16 mimics the kernel's MXU operand cast."""
    def mm(a, w):
        if matmul_dtype is not None:
            a = a.astype(matmul_dtype)
            w = w.astype(matmul_dtype)
        return jnp.dot(a, w, preferred_element_type=jnp.float32)

    def ln(h):
        m = jnp.mean(h, axis=-1, keepdims=True)
        c = h - m
        v = jnp.mean(c * c, axis=-1, keepdims=True)
        return c * lax.rsqrt(v + _LN_EPS)

    h = jnp.maximum(ln(mm(x, w0) + b0), 0.0)
    h = jnp.maximum(ln(mm(h, w1) + b1), 0.0)
    return mm(h, w2) + b2


if __name__ == "__main__":
    hidden_size = 32
    input_dim = 16

    key = jax.random.PRNGKey(0)
    kx, kp, kx2, kx3 = jax.random.split(key, 4)
    params = init_params(kp, hidden_size, input_dim)   # f32 masters (for the reference)
    dev_params = prepare_params(params)                # bf16 weights / f32 biases, once

    # 1) Small batch, single grid step.
    x = jax.random.normal(kx, (8, hidden_size), jnp.float32)
    out = jax.block_until_ready(custom_decoder_forward(x, *dev_params))
    assert out.shape == (8, input_dim)
    assert jnp.allclose(out, reference_forward(x, *params, matmul_dtype=jnp.bfloat16),
                        atol=1e-3, rtol=1e-3), "mismatch vs bf16-matched reference"
    assert jnp.allclose(out, reference_forward(x, *params),
                        atol=5e-2, rtol=5e-2), "mismatch vs f32 reference"

    # 2) Ragged batch + multi-step grid (exercises the cdiv tail block and megacore split).
    x2 = jax.random.normal(kx2, (40, hidden_size), jnp.float32)
    out2 = jax.block_until_ready(custom_decoder_forward(x2, *dev_params, block_b=24))
    assert out2.shape == (40, input_dim)
    assert jnp.allclose(out2, reference_forward(x2, *params, matmul_dtype=jnp.bfloat16),
                        atol=1e-3, rtol=1e-3), "mismatch vs reference (ragged multi-step)"

    # 3) Default large-tile path with the >=2-step megacore clamp.
    x3 = jax.random.normal(kx3, (256, hidden_size), jnp.float32)
    out3 = jax.block_until_ready(custom_decoder_forward(x3, *dev_params))
    assert out3.shape == (256, input_dim)
    assert jnp.allclose(out3, reference_forward(x3, *params, matmul_dtype=jnp.bfloat16),
                        atol=1e-3, rtol=1e-3), "mismatch vs reference (default tile)"

    print("KERNEL_OK")
</pallas_src>

<mosaic_0001>
module attributes {stable_mosaic.version = 11 : i64} {
  func.func @_decoder_kernel(%arg0: i32, %arg1: memref<8x32xf32, #tpu.memory_space<vmem>>, %arg2: memref<32x32xbf16, #tpu.memory_space<vmem>>, %arg3: memref<1x32xf32, #tpu.memory_space<vmem>>, %arg4: memref<32x32xbf16, #tpu.memory_space<vmem>>, %arg5: memref<1x32xf32, #tpu.memory_space<vmem>>, %arg6: memref<32x16xbf16, #tpu.memory_space<vmem>>, %arg7: memref<1x16xf32, #tpu.memory_space<vmem>>, %arg8: memref<8x16xf32, #tpu.memory_space<vmem>>) attributes {dimension_semantics = [#tpu.dimension_semantics<parallel>], iteration_bounds = array<i64: 1>, scalar_prefetch = 0 : i64, scratch_operands = 0 : i64, tpu.core_type = #tpu.core_type<tc>, window_params = [{transform_indices = @transform_0, window_bounds = array<i64: 8, 32>}, {pipeline_mode = #tpu.pipeline_mode<synchronous>, transform_indices = @transform_1, window_bounds = array<i64: 32, 32>}, {pipeline_mode = #tpu.pipeline_mode<synchronous>, transform_indices = @transform_2, window_bounds = array<i64: 1, 32>}, {pipeline_mode = #tpu.pipeline_mode<synchronous>, transform_indices = @transform_3, window_bounds = array<i64: 32, 32>}, {pipeline_mode = #tpu.pipeline_mode<synchronous>, transform_indices = @transform_4, window_bounds = array<i64: 1, 32>}, {pipeline_mode = #tpu.pipeline_mode<synchronous>, transform_indices = @transform_5, window_bounds = array<i64: 32, 16>}, {pipeline_mode = #tpu.pipeline_mode<synchronous>, transform_indices = @transform_6, window_bounds = array<i64: 1, 16>}, {transform_indices = @transform_7, window_bounds = array<i64: 8, 16>}]} {
    %c0 = arith.constant 0 : index
    %c0_0 = arith.constant 0 : index
    %0 = vector.load %arg1[%c0, %c0_0] : memref<8x32xf32, #tpu.memory_space<vmem>>, vector<8x32xf32>
    %1 = arith.truncf %0 : vector<8x32xf32> to vector<8x32xbf16>
    %c0_1 = arith.constant 0 : index
    %c0_2 = arith.constant 0 : index
    %2 = vector.load %arg2[%c0_1, %c0_2] : memref<32x32xbf16, #tpu.memory_space<vmem>>, vector<32x32xbf16>
    %cst = arith.constant dense<0.000000e+00> : vector<8x32xf32>
    %3 = tpu.matmul %1, %2, %cst {dimension_numbers = #tpu.dot_dimension_numbers<[1], [0], [0], [1], [0, 0, 1, 1], [], []>} : vector<8x32xbf16>, vector<32x32xbf16>, vector<8x32xf32> -> vector<8x32xf32>
    %c0_3 = arith.constant 0 : index
    %c0_4 = arith.constant 0 : index
    %4 = vector.load %arg3[%c0_3, %c0_4] : memref<1x32xf32, #tpu.memory_space<vmem>>, vector<1x32xf32>
    %5 = vector.broadcast %4 : vector<1x32xf32> to vector<8x32xf32>
    %6 = arith.addf %3, %5 : vector<8x32xf32>
    %cst_5 = arith.constant dense<0.000000e+00> : vector<8xf32>
    %7 = vector.multi_reduction <add>, %6, %cst_5 [1] : vector<8x32xf32> to vector<8xf32>
    %8 = vector.shape_cast %7 : vector<8xf32> to vector<8x1xf32>
    %cst_6 = arith.constant 3.125000e-02 : f32
    %9 = vector.broadcast %cst_6 : f32 to vector<8x1xf32>
    %10 = arith.mulf %8, %9 : vector<8x1xf32>
    %11 = vector.broadcast %10 : vector<8x1xf32> to vector<8x32xf32>
    %12 = arith.subf %6, %11 : vector<8x32xf32>
    %13 = arith.mulf %12, %12 : vector<8x32xf32>
    %cst_7 = arith.constant dense<0.000000e+00> : vector<8xf32>
    %14 = vector.multi_reduction <add>, %13, %cst_7 [1] : vector<8x32xf32> to vector<8xf32>
    %15 = vector.shape_cast %14 : vector<8xf32> to vector<8x1xf32>
    %cst_8 = arith.constant 3.125000e-02 : f32
    %16 = vector.broadcast %cst_8 : f32 to vector<8x1xf32>
    %17 = arith.mulf %15, %16 : vector<8x1xf32>
    %cst_9 = arith.constant 9.99999974E-6 : f32
    %18 = vector.broadcast %cst_9 : f32 to vector<8x1xf32>
    %19 = arith.addf %17, %18 : vector<8x1xf32>
    %20 = math.rsqrt %19 : vector<8x1xf32>
    %21 = vector.broadcast %20 : vector<8x1xf32> to vector<8x32xf32>
    %22 = arith.mulf %12, %21 : vector<8x32xf32>
    %cst_10 = arith.constant 0.000000e+00 : f32
    %23 = vector.broadcast %cst_10 : f32 to vector<8x32xf32>
    %24 = arith.maximumf %22, %23 : vector<8x32xf32>
    %25 = arith.truncf %24 : vector<8x32xf32> to vector<8x32xbf16>
    %c0_11 = arith.constant 0 : index
    %c0_12 = arith.constant 0 : index
    %26 = vector.load %arg4[%c0_11, %c0_12] : memref<32x32xbf16, #tpu.memory_space<vmem>>, vector<32x32xbf16>
    %cst_13 = arith.constant dense<0.000000e+00> : vector<8x32xf32>
    %27 = tpu.matmul %25, %26, %cst_13 {dimension_numbers = #tpu.dot_dimension_numbers<[1], [0], [0], [1], [0, 0, 1, 1], [], []>} : vector<8x32xbf16>, vector<32x32xbf16>, vector<8x32xf32> -> vector<8x32xf32>
    %c0_14 = arith.constant 0 : index
    %c0_15 = arith.constant 0 : index
    %28 = vector.load %arg5[%c0_14, %c0_15] : memref<1x32xf32, #tpu.memory_space<vmem>>, vector<1x32xf32>
    %29 = vector.broadcast %28 : vector<1x32xf32> to vector<8x32xf32>
    %30 = arith.addf %27, %29 : vector<8x32xf32>
    %cst_16 = arith.constant dense<0.000000e+00> : vector<8xf32>
    %31 = vector.multi_reduction <add>, %30, %cst_16 [1] : vector<8x32xf32> to vector<8xf32>
    %32 = vector.shape_cast %31 : vector<8xf32> to vector<8x1xf32>
    %cst_17 = arith.constant 3.125000e-02 : f32
    %33 = vector.broadcast %cst_17 : f32 to vector<8x1xf32>
    %34 = arith.mulf %32, %33 : vector<8x1xf32>
    %35 = vector.broadcast %34 : vector<8x1xf32> to vector<8x32xf32>
    %36 = arith.subf %30, %35 : vector<8x32xf32>
    %37 = arith.mulf %36, %36 : vector<8x32xf32>
    %cst_18 = arith.constant dense<0.000000e+00> : vector<8xf32>
    %38 = vector.multi_reduction <add>, %37, %cst_18 [1] : vector<8x32xf32> to vector<8xf32>
    %39 = vector.shape_cast %38 : vector<8xf32> to vector<8x1xf32>
    %cst_19 = arith.constant 3.125000e-02 : f32
    %40 = vector.broadcast %cst_19 : f32 to vector<8x1xf32>
    %41 = arith.mulf %39, %40 : vector<8x1xf32>
    %cst_20 = arith.constant 9.99999974E-6 : f32
    %42 = vector.broadcast %cst_20 : f32 to vector<8x1xf32>
    %43 = arith.addf %41, %42 : vector<8x1xf32>
    %44 = math.rsqrt %43 : vector<8x1xf32>
    %45 = vector.broadcast %44 : vector<8x1xf32> to vector<8x32xf32>
    %46 = arith.mulf %36, %45 : vector<8x32xf32>
    %cst_21 = arith.constant 0.000000e+00 : f32
    %47 = vector.broadcast %cst_21 : f32 to vector<8x32xf32>
    %48 = arith.maximumf %46, %47 : vector<8x32xf32>
    %49 = arith.truncf %48 : vector<8x32xf32> to vector<8x32xbf16>
    %c0_22 = arith.constant 0 : index
    %c0_23 = arith.constant 0 : index
    %50 = vector.load %arg6[%c0_22, %c0_23] : memref<32x16xbf16, #tpu.memory_space<vmem>>, vector<32x16xbf16>
    %cst_24 = arith.constant dense<0.000000e+00> : vector<8x16xf32>
    %51 = tpu.matmul %49, %50, %cst_24 {dimension_numbers = #tpu.dot_dimension_numbers<[1], [0], [0], [1], [0, 0, 1, 1], [], []>} : vector<8x32xbf16>, vector<32x16xbf16>, vector<8x16xf32> -> vector<8x16xf32>
    %c0_25 = arith.constant 0 : index
    %c0_26 = arith.constant 0 : index
    %52 = vector.load %arg7[%c0_25, %c0_26] : memref<1x16xf32, #tpu.memory_space<vmem>>, vector<1x16xf32>
    %53 = vector.broadcast %52 : vector<1x16xf32> to vector<8x16xf32>
    %54 = arith.addf %51, %53 : vector<8x16xf32>
    %c0_27 = arith.constant 0 : index
    %c0_28 = arith.constant 0 : index
    %55 = vector.load %arg8[%c0_27, %c0_28] : memref<8x16xf32, #tpu.memory_space<vmem>>, vector<8x16xf32>
    tpu.vector_store %arg8[%c0_27, %c0_28], %54 {strides = array<i32>} : memref<8x16xf32, #tpu.memory_space<vmem>>, vector<8x16xf32>,
    return
  }
  func.func @transform_0(%arg0: i32) -> (i32, i32) {
    %c0_i32 = arith.constant 0 : i32
    %c0_i32_0 = arith.constant 0 : i32
    return %arg0, %c0_i32 : i32, i32
  }
  func.func @transform_1(%arg0: i32) -> (i32, i32) {
    %c0_i32 = arith.constant 0 : i32
    %c0_i32_0 = arith.constant 0 : i32
    %c0_i32_1 = arith.constant 0 : i32
    return %c0_i32, %c0_i32_0 : i32, i32
  }
  func.func @transform_2(%arg0: i32) -> (i32, i32) {
    %c0_i32 = arith.constant 0 : i32
    %c0_i32_0 = arith.constant 0 : i32
    %c0_i32_1 = arith.constant 0 : i32
    return %c0_i32, %c0_i32_0 : i32, i32
  }
  func.func @transform_3(%arg0: i32) -> (i32, i32) {
    %c0_i32 = arith.constant 0 : i32
    %c0_i32_0 = arith.constant 0 : i32
    %c0_i32_1 = arith.constant 0 : i32
    return %c0_i32, %c0_i32_0 : i32, i32
  }
  func.func @transform_4(%arg0: i32) -> (i32, i32) {
    %c0_i32 = arith.constant 0 : i32
    %c0_i32_0 = arith.constant 0 : i32
    %c0_i32_1 = arith.constant 0 : i32
    return %c0_i32, %c0_i32_0 : i32, i32
  }
  func.func @transform_5(%arg0: i32) -> (i32, i32) {
    %c0_i32 = arith.constant 0 : i32
    %c0_i32_0 = arith.constant 0 : i32
    %c0_i32_1 = arith.constant 0 : i32
    return %c0_i32, %c0_i32_0 : i32, i32
  }
  func.func @transform_6(%arg0: i32) -> (i32, i32) {
    %c0_i32 = arith.constant 0 : i32
    %c0_i32_0 = arith.constant 0 : i32
    %c0_i32_1 = arith.constant 0 : i32
    return %c0_i32, %c0_i32_0 : i32, i32
  }
  func.func @transform_7(%arg0: i32) -> (i32, i32) {
    %c0_i32 = arith.constant 0 : i32
    %c0_i32_0 = arith.constant 0 : i32
    return %arg0, %c0_i32 : i32, i32
  }
}

</mosaic_0001>

<bundles_post_ra>
// kernel: custom_decoder_forward.1
= control target key start
LH: loop header
LB: loop body
LE: loop exit
PB: predicated region body
PF: predicated region fallthrough
CT: control target
= control target key end

     0   :  { %12 = vsyncpa [#allocation3], 0  ;;  %s497_s0 = inlined_call_operand.hbm [shape: f32[8,32], index: 0, kind: input, shape index: {}]   ;;  %s498_s1 = inlined_call_operand.vmem [shape: bf16[32,32], index: 1, kind: input, shape index: {}]   ;;  %s499_s2 = inlined_call_operand.vmem [shape: f32[1,32], index: 2, kind: input, shape index: {}]   ;;  %s500_s3 = inlined_call_operand.vmem [shape: bf16[32,32], index: 3, kind: input, shape index: {}]   ;;  %s501_s4 = inlined_call_operand.vmem [shape: f32[1,32], index: 4, kind: input, shape index: {}]   ;;  %s502_s5 = inlined_call_operand.vmem [shape: bf16[32,16], index: 5, kind: input, shape index: {}]   ;;  %s503_s6 = inlined_call_operand.vmem [shape: f32[1,16], index: 6, kind: input, shape index: {}]   ;;  %s504_s7 = inlined_call_operand.hbm [shape: f32[8,16], index: 7, kind: output, shape index: {}]  }
   0x1   :  { %13 = vsyncpa [#allocation4], 0  ;;  %s395_s24 = smov [#allocation2]   ;;  %s347_s28 = scalar_lea.hbm %s497_s0, 128 }
   0x2   :  { %s20_s25 = sshll.u32 %s395_s24, 4  ;;  %p348_p0 = scmp.ne.s32.totalorder %s497_s0, %s347_s28  ;;  %s21_s25 = int_to_ptr.vmem [resolvable:$true] %s20_s25 }
   0x3   :  { %p351_p1 = scmp.lt.u32.totalorder %s347_s28, %s497_s0 }
   0x5   :  { %p353_p2 = pnand %p351_p1, %p348_p0 }
   0x7   :  { %356 = shalt.err (!%p353_p2)
}
   0x8   :  { %s357_s10 = scalar_lea.vmem %s21_s25, 128  ;;  %p362_p4 = scmp.lt.s32.totalorder %s21_s25, %s21_s25 }
   0x9   :  { %p358_p3 = scmp.ne.s32.totalorder %s21_s25, %s357_s10  ;;  %p363_p5 = scmp.lt.s32.totalorder %s357_s10, %s357_s10 }
   0xb   :  { %p364_p6 = por %p363_p5, %p362_p4 }
   0xd   :  { %p365_p7 = pnand %p364_p6, %p358_p3 }
   0xf   :  { %368 = shalt.err (!%p365_p7)
}
  0x10   :  { %23 = dma.hbm_to_vmem [thread:$0]  %s497_s0, 128, %s21_s25, [#allocation3]  }
  0x11   :  { %391 = dma.done.wait [#allocation3], 128  }
  0x12   :  { %392 = vsyncadd [#allocation3], 4294967168  ;;  %v396_v0 = vmov 0.0   ;;  %vm397_vm0 = vmmov 0   ;;  %v337_v1 = vld [vmem:[%s498_s1] sm:$0xff]   ;;  %v338_v2 = vld [vmem:[%s498_s1 + $0x8] sm:$0xff]  }
  0x13   :  { %309 = vmatprep.subr.bf16.mxu0 %v396_v0  ;;  %313 = vmatprep.mubr.msk.bf16.mxu0 %vm397_vm0, %v396_v0  ;;  %v40_v3 = vld [vmem:[#allocation2] sm:$0xff]  ;;  %vm65_vm1 = vcmask 261120   ;;  %v340_v18 = vld [vmem:[%s500_s3 + $0x8] sm:$0xff]   ;;  %s398_s26 = smov [#allocation5]   ;;  %vm271_vm2 = vcmask 130048  }
  0x14   :  { %317 = vmatprep.subr.bf16.mxu1 %v396_v0  ;;  %321 = vmatprep.mubr.msk.bf16.mxu1 %vm397_vm0, %v396_v0  ;;  %v41_v4 = vpack.c.bf16 %v40_v3, %v40_v3  ;;  %v288_v5 = vld [vmem:[%s499_s2] ss:$0 sm:$0xff]  ;;  %v342_v39 = vld [vmem:[%s502_s5 + $0x8] sm:$0xff]   ;;  %s279_s27 = sshll.u32 %s398_s26, 4  ;;  %s280_s27 = int_to_ptr.vmem [resolvable:$true] %s279_s27 }
  0x15   :  { %310 = vmatpush3.bf16.msra.mxu0 %v337_v1  ;;  %v339_v17 = vld [vmem:[%s500_s3] sm:$0xff]   ;;  %p374_p9 = scmp.lt.s32.totalorder %s280_s27, %s280_s27 }
  0x16   :  { %311 = vmatprep.subr.bf16.mxu0 %v396_v0  ;;  %318 = vmatpush3.bf16.msra.mxu1 %v339_v17  ;;  %v292_v26 = vld [vmem:[%s501_s4] ss:$0 sm:$0xff] }
  0x17   :  { %319 = vmatprep.subr.bf16.mxu1 %v396_v0  ;;  %v341_v38 = vld [vmem:[%s502_s5] sm:$0xff]   ;;  %s369_s5 = scalar_lea.vmem %s280_s27, 128 }
  0x18   :  { %v296_v47 = vld [vmem:[%s503_s6] ss:$0 sm:$0xff]  ;;  %p370_p8 = scmp.ne.s32.totalorder %s280_s27, %s369_s5  ;;  %p375_p10 = scmp.lt.s32.totalorder %s369_s5, %s369_s5 }
  0x19   :  { %312 = vmatpush3.bf16.msra.mxu0 %v338_v2 }
  0x1a   :  { %325 = vmatprep.subr.bf16.mxu0 %v396_v0  ;;  %320 = vmatpush3.bf16.msra.mxu1 %v340_v18  ;;  %p376_p11 = por %p375_p10, %p374_p9 }
  0x1c   :  { %314 = vmatmul.mubr.msk.bf16.vlgmr.msra.gmra.mrb[0].mxu0 %vm65_vm1, %v41_v4  ;;  %p377_p12 = pnand %p376_p11, %p370_p8 }
  0x1d   :  { %329 = vmatprep.mubr.msk.bf16.mxu0 %vm397_vm0, %v396_v0  ;;  %326 = vmatpush3.bf16.msra.mxu0 %v341_v38 }
  0x1e   :  { %327 = vmatprep.subr.bf16.mxu0 %v396_v0 }
  0x21   :  { %328 = vmatpush3.bf16.msra.mxu0 %v342_v39 }
  0xef   :  { %v103_v6 = vpop.f32.mrb[0].mxu0 }
  0xf0   :  { %v104_v7 = vadd.f32 %v288_v5, %v103_v6  ;;  %v315_v8 = vpop.f32.mrb[1].mxu0 }
  0xf1   :  { %v106_v9 = vpop.f32.mrb[2].mxu0 }
  0xf2   :  { %v316_v10 = vpop.f32.mrb[3].mxu0  ;;  %v109_v11 = vsel %vm65_vm1, %v104_v7, 0.0 }
  0xf3   :  { %110 = vadd.xlane.f32.xlu0 %v109_v11 }
 0x180   :  { %v111_v12 = vpop.xlane.xlu0 %110 }
 0x181   :  { %v112_v13 = vmul.f32 0.03125, %v111_v12 }
 0x183   :  { %v113_v14 = vsub.f32 %v104_v7, %v112_v13 }
 0x185   :  { %v114_v15 = vmul.f32 %v113_v14, %v113_v14 }
 0x187   :  { %v115_v16 = vsel %vm65_vm1, %v114_v15, 0.0 }
 0x188   :  { %116 = vadd.xlane.f32.xlu0 %v115_v16 }
 0x215   :  { %v117_v19 = vpop.xlane.xlu0 %116 }
 0x216   :  { %v118_v20 = vmul.f32 0.03125, %v117_v19 }
 0x218   :  { %v119_v21 = vadd.f32 1e-05, %v118_v20 }
 0x21a   :  { %343 = vrsqrt.f32 %v119_v21 }
 0x224   :  { %v344_v22 = vpop.eup %343 }
 0x225   :  { %v121_v23 = vmul.f32 %v344_v22, %v113_v14 }
 0x227   :  { %v122_v24 = vmax.f32 %v121_v23, 0.0 }
 0x229   :  { %v123_v25 = vpack.c.bf16 %v122_v24, %v122_v24 }
 0x22b   :  { %322 = vmatmul.mubr.msk.bf16.vlgmr.msra.gmra.mrb[0].mxu1 %vm65_vm1, %v123_v25 }
 0x2fe   :  { %v184_v27 = vpop.f32.mrb[0].mxu1 }
 0x2ff   :  { %v185_v28 = vadd.f32 %v292_v26, %v184_v27  ;;  %v323_v29 = vpop.f32.mrb[1].mxu1 }
 0x300   :  { %v187_v30 = vpop.f32.mrb[2].mxu1 }
 0x301   :  { %v324_v31 = vpop.f32.mrb[3].mxu1  ;;  %v190_v32 = vsel %vm65_vm1, %v185_v28, 0.0 }
 0x302   :  { %191 = vadd.xlane.f32.xlu1 %v190_v32 }
 0x38f   :  { %v192_v33 = vpop.xlane.xlu1 %191 }
 0x390   :  { %v193_v34 = vmul.f32 0.03125, %v192_v33 }
 0x392   :  { %v194_v35 = vsub.f32 %v185_v28, %v193_v34 }
 0x394   :  { %v195_v36 = vmul.f32 %v194_v35, %v194_v35 }
 0x396   :  { %v196_v37 = vsel %vm65_vm1, %v195_v36, 0.0 }
 0x397   :  { %197 = vadd.xlane.f32.xlu1 %v196_v37 }
 0x424   :  { %v198_v40 = vpop.xlane.xlu1 %197 }
 0x425   :  { %v199_v41 = vmul.f32 0.03125, %v198_v40 }
 0x427   :  { %v200_v42 = vadd.f32 1e-05, %v199_v41 }
 0x429   :  { %345 = vrsqrt.f32 %v200_v42 }
 0x433   :  { %v346_v43 = vpop.eup %345 }
 0x434   :  { %v202_v44 = vmul.f32 %v346_v43, %v194_v35 }
 0x436   :  { %v203_v45 = vmax.f32 %v202_v44, 0.0 }
 0x438   :  { %v204_v46 = vpack.c.bf16 %v203_v45, %v203_v45 }
 0x43a   :  { %330 = vmatmul.mubr.msk.bf16.vlgmr.msra.gmra.mrb[4].mxu0 %vm65_vm1, %v204_v46 }
 0x50d   :  { %v265_v48 = vpop.f32.mrb[4].mxu0 }
 0x50e   :  { %v266_v49 = vadd.f32 %v296_v47, %v265_v48  ;;  %v331_v50 = vpop.f32.mrb[5].mxu0 }
 0x50f   :  { %v268_v51 = vpop.f32.mrb[6].mxu0 }
 0x510   :  { %v332_v52 = vpop.f32.mrb[7].mxu0  ;;  %272 = vst.msk [vmem:[#allocation5] sm:$0xff] %vm271_vm2, %v266_v49 }
 0x511   :  { %380 = shalt.err (!%p377_p12)
}
 0x512   :  { %s381_s6 = scalar_lea.hbm %s504_s7, 128 }
 0x513   :  { %p382_p13 = scmp.ne.s32.totalorder %s504_s7, %s381_s6  ;;  %p385_p0 = scmp.lt.u32.totalorder %s381_s6, %s504_s7 }
 0x515   :  { %p387_p1 = pnand %p385_p0, %p382_p13 }
 0x517   :  { %390 = shalt.err (!%p387_p1)
}
 0x518   :  { %282 = dma.vmem_to_hbm [thread:$0]  %s280_s27, 128, %s504_s7, [#allocation4]  }
 0x519   :  { %393 = dma.done.wait [#allocation4], 128  }
 0x51a   :  { %394 = vsyncadd [#allocation4], 4294967168 }
 0x51b   :  { %286 = vsyncpa [#allocation3], 1 }
 0x51c   :  { %287 = vsyncpa [#allocation4], 1 }

</bundles_post_ra>
